<compile_context>
chip_gen: v7x
topology: tpu7x:2x2x1
jax: 0.10.0
libtpu: 0.0.40
codegen_flags: <defaults>
</compile_context>

<pallas_src>
import math

import numpy as np
import jax
import jax.numpy as jnp
from jax import lax
from jax.experimental import pallas as pl
from jax.experimental.pallas import tpu as pltpu


# ----------------------------- parameter setup (plain JAX glue) --------------

def log_2d_kernel(k: int, sigma):
    """JAX port of LoG_2d: returns the (k, k) float32 Laplacian-of-Gaussian kernel."""
    ax = jnp.round(jnp.linspace(-math.floor(k / 2), math.floor(k / 2), k)).astype(jnp.float32)
    y = jnp.repeat(ax[:, None], k, axis=1)
    x = jnp.repeat(ax[None, :], k, axis=0)
    x2 = x ** 2
    y2 = y ** 2
    s2 = sigma ** 2
    s4 = sigma ** 4
    hg = jnp.exp(-(x2 + y2) / (2.0 * s2))
    kernel_t = hg * (x2 + y2 - 2.0 * s2) / (s4 * jnp.sum(hg))
    kernel = kernel_t - jnp.sum(kernel_t) / float(k ** 2)
    return kernel


# ----------------------------- Pallas kernels --------------------------------

def make_conv_kernel(C, H, W, k, pad):
    """Pass 1: LoG conv of one image + per-image max(x) / max|B| (fused reductions).

    Exploits the replicated weight: sum over input channels first, then a single
    k*k tap accumulation (identical result for every output channel)."""

    def conv_kernel(taps_ref, x_ref, b_ref, maxb_ref, maxx_ref):
        # taps_ref: SMEM (k*k,) f32        -- the single LoG tap kernel
        # x_ref:    VMEM (1, C, H, W) f32  -- one image, natural layout (no pre-pad)
        # b_ref:    VMEM (1, H, W)  f32    -- conv output (same for every out-chan)
        # maxb_ref: VMEM (1, 1, 1)  f32    -- per-image max|B|
        # maxx_ref: VMEM (1, 1, 1)  f32    -- per-image max(x)
        x = x_ref[...]                                     # (1, C, H, W)

        # Per-image max(x), fused here so the wrapper never re-reads x from HBM.
        mx = jnp.max(jnp.max(x, axis=1))                   # scalar
        maxx_ref[...] = jnp.full((1, 1, 1), mx, dtype=jnp.float32)

        # Replicated LoG weight => channel-sum once, then one k*k-tap conv.
        s = jnp.sum(x, axis=1)                             # (1, H, W)

        # Border masks for the in-register halo (zero-padding semantics).
        row = lax.broadcasted_iota(jnp.int32, (1, H, W), 1)
        col = lax.broadcasted_iota(jnp.int32, (1, H, W), 2)

        def shifted(oy, ox):
            """shifted[y, x] = s[y+oy, x+ox] with zero fill outside the image."""
            v = s
            if oy != 0:
                v = pltpu.roll(v, (-oy) % H, axis=1)       # XLU sublane rotate
            if ox != 0:
                v = pltpu.roll(v, (-ox) % W, axis=2)       # XLU lane rotate
            valid = None
            if oy > 0:
                valid = row < (H - oy)
            elif oy < 0:
                valid = row >= (-oy)
            if ox > 0:
                c = col < (W - ox)
                valid = c if valid is None else (valid & c)
            elif ox < 0:
                c = col >= (-ox)
                valid = c if valid is None else (valid & c)
            if valid is not None:
                v = jnp.where(valid, v, 0.0)
            return v

        # Hoist all SMEM scalar tap reads ahead of the MAC chain.
        taps = [taps_ref[t] for t in range(k * k)]
        terms = [taps[t] * shifted(t // k - pad, t % k - pad) for t in range(k * k)]

        # Two partial accumulators so the dependent adds can co-issue on the 4 VALU
        # slots (no f32 FMA on v6e).  TODO(synk): for k >= 5 switch this unroll to
        # lax.fori_loop(..., unroll=True) and use the separable LoG = Gxx + Gyy
        # decomposition (4k taps instead of k^2).
        acc0, acc1 = terms[0], terms[1]
        for t in range(2, k * k, 2):
            acc0 = acc0 + terms[t]
        for t in range(3, k * k, 2):
            acc1 = acc1 + terms[t]
        acc = acc0 + acc1                                   # (1, H, W)

        # Per-image max|B|, fused here (wrapper only reduces N scalars afterwards).
        maxb_ref[...] = jnp.full((1, 1, 1), jnp.max(jnp.abs(acc)), dtype=jnp.float32)
        b_ref[...] = acc

    return conv_kernel


def combine_kernel(scale_ref, x_ref, b_ref, o_ref):
    """Pass 2: out = clip(x + scale * B, 0, 255) on a lane-dense (C, H*W) layout."""
    # scale_ref: SMEM (1,) f32  -- alpha * max(x) / max|B| folded into one scalar
    # x_ref:  VMEM (1, C, H*W);  b_ref: VMEM (1, 1, H*W);  o_ref: VMEM (1, C, H*W)
    a = x_ref[...] + scale_ref[0] * b_ref[...]              # (1,1,HW) broadcasts over C
    o_ref[...] = jnp.clip(a, 0.0, 255.0)


# ----------------------------- wrapper ----------------------------------------

def usm_forward(x, log_kernel, alpha):
    """x: (N, C, H, W) f32; log_kernel: (k, k) f32 (shared by all (o, c) pairs);
    alpha: (1,) f32."""
    N, C, H, W = x.shape
    k = log_kernel.shape[0]
    stride, dilation = 1, 1  # module defaults; F.conv2d in the reference only uses padding
    # NOTE: formula inherited from the PyTorch module (it uses in_channels where a
    # spatial size would normally appear); only valid 'same' padding for stride=1,
    # dilation=1 -- the assert guards other configs.
    pad = int((stride * (C - 1) + (k - 1) * (dilation - 1) + k - C) / 2)
    assert H + 2 * pad - k + 1 == H and W + 2 * pad - k + 1 == W, "expects 'same' conv"

    x = x.astype(jnp.float32)
    taps = log_kernel.reshape(-1).astype(jnp.float32)

    parallel = pltpu.CompilerParams(dimension_semantics=("parallel",))

    # ---- pass 1: per-image conv + fused per-image max(x), max|B| ----
    bc, maxb, maxx = pl.pallas_call(
        make_conv_kernel(C, H, W, k, pad),
        out_shape=(
            jax.ShapeDtypeStruct((N, H, W), jnp.float32),   # B (one channel's worth)
            jax.ShapeDtypeStruct((N, 1, 1), jnp.float32),   # per-image max|B|
            jax.ShapeDtypeStruct((N, 1, 1), jnp.float32),   # per-image max(x)
        ),
        grid=(N,),
        in_specs=[
            pl.BlockSpec(memory_space=pltpu.MemorySpace.SMEM),      # LoG taps
            pl.BlockSpec((1, C, H, W), lambda n: (n, 0, 0, 0)),     # image (natural layout)
        ],
        out_specs=(
            pl.BlockSpec((1, H, W), lambda n: (n, 0, 0)),
            pl.BlockSpec((1, 1, 1), lambda n: (n, 0, 0)),
            pl.BlockSpec((1, 1, 1), lambda n: (n, 0, 0)),
        ),
        compiler_params=parallel,
    )(taps, x)

    # ---- global normalization folded into a single scalar ----
    # Only N scalars are reduced here; no full re-read of x or B from HBM.
    max_b = jnp.max(maxb)
    max_in = jnp.max(maxx)
    # NOTE: matches the reference -- no eps guard, so max|B| == 0 gives NaN like PyTorch.
    # Folding alpha*max_in/max_b into one scalar reorders float ops slightly vs the
    # reference max_in*(B/max_b); well within the validation tolerance.
    scale = (alpha.reshape(()) * max_in / max_b).reshape(1).astype(jnp.float32)

    # Lane-dense layout for the full-size elementwise pass: last dim H*W (a multiple of
    # 128 here) -> full unmasked vector stores.  These reshapes are free bitcasts.
    x_flat = x.reshape(N, C, H * W)
    b_flat = bc.reshape(N, 1, H * W)

    out_flat = pl.pallas_call(
        combine_kernel,
        out_shape=jax.ShapeDtypeStruct((N, C, H * W), jnp.float32),
        grid=(N,),
        in_specs=[
            pl.BlockSpec(memory_space=pltpu.MemorySpace.SMEM),      # folded scale
            pl.BlockSpec((1, C, H * W), lambda n: (n, 0, 0)),       # input image
            pl.BlockSpec((1, 1, H * W), lambda n: (n, 0, 0)),       # per-image B
        ],
        out_specs=pl.BlockSpec((1, C, H * W), lambda n: (n, 0, 0)),
        compiler_params=parallel,
    )(scale, x_flat, b_flat)

    return out_flat.reshape(N, C, H, W)


# ----------------------------- pure-JAX reference (for validation) -----------

def usm_reference(x, weight, alpha, pad):
    B = jax.lax.conv_general_dilated(
        x, weight, window_strides=(1, 1),
        padding=[(pad, pad), (pad, pad)],
        dimension_numbers=("NCHW", "OIHW", "NCHW"))
    max_b = jnp.max(jnp.abs(B))
    max_in = jnp.max(x)
    b_norm = max_in * (B / max_b)
    a = x + alpha[0] * b_norm
    return jnp.clip(a, 0.0, 255.0)


if __name__ == "__main__":
    # TODO(synk): the PyTorch module's `self.cont` batch counter + print side-effect
    # is host-side logging with no compute; intentionally not reproduced.
    N, C, H, W = 2, 4, 16, 16
    ksz = 3

    key = jax.random.PRNGKey(0)
    k_sig, k_alpha, k_x = jax.random.split(key, 3)

    # Deterministic parameter init mirroring init_weights()/i_weights():
    sigma = jax.random.uniform(k_sig, (), jnp.float32, 0.0001, 0.9999)   # sigma ~ U(1e-4, 0.9999)
    alpha = jax.random.uniform(k_alpha, (1,), jnp.float32, 0.0, 10.0)    # alpha ~ U(0, 10)
    x = jax.random.uniform(k_x, (N, C, H, W), jnp.float32, 0.0, 255.0)   # image-like input

    # Single LoG kernel (LoG2d replicates it over every (out_channel, in_channel) pair).
    log_k = log_2d_kernel(ksz, sigma)

    out = jax.block_until_ready(usm_forward(x, log_k, alpha))

    # Validate against the full replicated-weight conv, exactly what F.conv2d sees.
    weight = jnp.broadcast_to(log_k, (C, C, ksz, ksz)).astype(jnp.float32)
    pad = (ksz - 1) // 2
    ref = jax.block_until_ready(usm_reference(x, weight, alpha, pad))
    np.testing.assert_allclose(np.asarray(out), np.asarray(ref), rtol=1e-3, atol=1e-2)

    print("KERNEL_OK")
</pallas_src>

<mosaic_0001>
module attributes {stable_mosaic.version = 11 : i64} {
  func.func @conv_kernel(%arg0: i32, %arg1: memref<9xf32, #tpu.memory_space<smem>>, %arg2: memref<1x4x16x16xf32, #tpu.memory_space<vmem>>, %arg3: memref<1x16x16xf32, #tpu.memory_space<vmem>>, %arg4: memref<1x1x1xf32, #tpu.memory_space<vmem>>, %arg5: memref<1x1x1xf32, #tpu.memory_space<vmem>>) attributes {dimension_semantics = [#tpu.dimension_semantics<parallel>], iteration_bounds = array<i64: 2>, scalar_prefetch = 0 : i64, scratch_operands = 0 : i64, tpu.core_type = #tpu.core_type<tc>, window_params = [{transform_indices = @transform_0, window_bounds = array<i64: 9>}, {transform_indices = @transform_1, window_bounds = array<i64: 1, 4, 16, 16>}, {transform_indices = @transform_2, window_bounds = array<i64: 1, 16, 16>}, {transform_indices = @transform_3, window_bounds = array<i64: 1, 1, 1>}, {transform_indices = @transform_4, window_bounds = array<i64: 1, 1, 1>}]} {
    %c0 = arith.constant 0 : index
    %c0_0 = arith.constant 0 : index
    %c0_1 = arith.constant 0 : index
    %c0_2 = arith.constant 0 : index
    %0 = vector.load %arg2[%c0, %c0_0, %c0_1, %c0_2] : memref<1x4x16x16xf32, #tpu.memory_space<vmem>>, vector<1x4x16x16xf32>
    %cst = arith.constant dense<0xFF800000> : vector<1x16x16xf32>
    %1 = vector.multi_reduction <maximumf>, %0, %cst [1] : vector<1x4x16x16xf32> to vector<1x16x16xf32>
    %2 = vector.shape_cast %1 : vector<1x16x16xf32> to vector<1x1x16x16xf32>
    %cst_3 = arith.constant dense<0xFF800000> : vector<1xf32>
    %3 = vector.multi_reduction <maximumf>, %2, %cst_3 [1, 2, 3] : vector<1x1x16x16xf32> to vector<1xf32>
    %4 = vector.shape_cast %3 : vector<1xf32> to vector<1x1x1x1xf32>
    %5 = vector.extract %4[0, 0, 0, 0] : f32 from vector<1x1x1x1xf32>
    %6 = vector.broadcast %5 : f32 to vector<1x1x1xf32>
    %c0_4 = arith.constant 0 : index
    %c0_5 = arith.constant 0 : index
    %c0_6 = arith.constant 0 : index
    %7 = vector.load %arg5[%c0_4, %c0_5, %c0_6] : memref<1x1x1xf32, #tpu.memory_space<vmem>>, vector<1x1x1xf32>
    tpu.vector_store %arg5[%c0_4, %c0_5, %c0_6], %6 {strides = array<i32>} : memref<1x1x1xf32, #tpu.memory_space<vmem>>, vector<1x1x1xf32>,
    %cst_7 = arith.constant dense<0.000000e+00> : vector<1x16x16xf32>
    %8 = vector.multi_reduction <add>, %0, %cst_7 [1] : vector<1x4x16x16xf32> to vector<1x16x16xf32>
    %9 = tpu.iota {dimensions = array<i32: 1>} : vector<1x16x16xi32>
    %10 = tpu.iota {dimensions = array<i32: 2>} : vector<1x16x16xi32>
    %c0_8 = arith.constant 0 : index
    %11 = memref.load %arg1[%c0_8] : memref<9xf32, #tpu.memory_space<smem>>
    %c1 = arith.constant 1 : index
    %12 = memref.load %arg1[%c1] : memref<9xf32, #tpu.memory_space<smem>>
    %c2 = arith.constant 2 : index
    %13 = memref.load %arg1[%c2] : memref<9xf32, #tpu.memory_space<smem>>
    %c3 = arith.constant 3 : index
    %14 = memref.load %arg1[%c3] : memref<9xf32, #tpu.memory_space<smem>>
    %c4 = arith.constant 4 : index
    %15 = memref.load %arg1[%c4] : memref<9xf32, #tpu.memory_space<smem>>
    %c5 = arith.constant 5 : index
    %16 = memref.load %arg1[%c5] : memref<9xf32, #tpu.memory_space<smem>>
    %c6 = arith.constant 6 : index
    %17 = memref.load %arg1[%c6] : memref<9xf32, #tpu.memory_space<smem>>
    %c7 = arith.constant 7 : index
    %18 = memref.load %arg1[%c7] : memref<9xf32, #tpu.memory_space<smem>>
    %c8 = arith.constant 8 : index
    %19 = memref.load %arg1[%c8] : memref<9xf32, #tpu.memory_space<smem>>
    %c1_i32 = arith.constant 1 : i32
    %20 = tpu.dynamic_rotate %8 by %c1_i32 dim 1 : vector<1x16x16xf32>, i32 -> vector<1x16x16xf32>
    %c1_i32_9 = arith.constant 1 : i32
    %21 = tpu.dynamic_rotate %20 by %c1_i32_9 dim 2 : vector<1x16x16xf32>, i32 -> vector<1x16x16xf32>
    %c1_i32_10 = arith.constant 1 : i32
    %22 = vector.broadcast %c1_i32_10 : i32 to vector<1x16x16xi32>
    %23 = arith.cmpi sge, %9, %22 : vector<1x16x16xi32>
    %c1_i32_11 = arith.constant 1 : i32
    %24 = vector.broadcast %c1_i32_11 : i32 to vector<1x16x16xi32>
    %25 = arith.cmpi sge, %10, %24 : vector<1x16x16xi32>
    %26 = arith.andi %23, %25 : vector<1x16x16xi1>
    %cst_12 = arith.constant 0.000000e+00 : f32
    %27 = vector.broadcast %cst_12 : f32 to vector<1x16x16xf32>
    %28 = arith.select %26, %21, %27 : vector<1x16x16xi1>, vector<1x16x16xf32>
    %29 = vector.broadcast %11 : f32 to vector<1x16x16xf32>
    %30 = arith.mulf %29, %28 : vector<1x16x16xf32>
    %c1_i32_13 = arith.constant 1 : i32
    %31 = tpu.dynamic_rotate %8 by %c1_i32_13 dim 1 : vector<1x16x16xf32>, i32 -> vector<1x16x16xf32>
    %c1_i32_14 = arith.constant 1 : i32
    %32 = vector.broadcast %c1_i32_14 : i32 to vector<1x16x16xi32>
    %33 = arith.cmpi sge, %9, %32 : vector<1x16x16xi32>
    %cst_15 = arith.constant 0.000000e+00 : f32
    %34 = vector.broadcast %cst_15 : f32 to vector<1x16x16xf32>
    %35 = arith.select %33, %31, %34 : vector<1x16x16xi1>, vector<1x16x16xf32>
    %36 = vector.broadcast %12 : f32 to vector<1x16x16xf32>
    %37 = arith.mulf %36, %35 : vector<1x16x16xf32>
    %c1_i32_16 = arith.constant 1 : i32
    %38 = tpu.dynamic_rotate %8 by %c1_i32_16 dim 1 : vector<1x16x16xf32>, i32 -> vector<1x16x16xf32>
    %c15_i32 = arith.constant 15 : i32
    %39 = tpu.dynamic_rotate %38 by %c15_i32 dim 2 : vector<1x16x16xf32>, i32 -> vector<1x16x16xf32>
    %c1_i32_17 = arith.constant 1 : i32
    %40 = vector.broadcast %c1_i32_17 : i32 to vector<1x16x16xi32>
    %41 = arith.cmpi sge, %9, %40 : vector<1x16x16xi32>
    %c15_i32_18 = arith.constant 15 : i32
    %42 = vector.broadcast %c15_i32_18 : i32 to vector<1x16x16xi32>
    %43 = arith.cmpi slt, %10, %42 : vector<1x16x16xi32>
    %44 = arith.andi %41, %43 : vector<1x16x16xi1>
    %cst_19 = arith.constant 0.000000e+00 : f32
    %45 = vector.broadcast %cst_19 : f32 to vector<1x16x16xf32>
    %46 = arith.select %44, %39, %45 : vector<1x16x16xi1>, vector<1x16x16xf32>
    %47 = vector.broadcast %13 : f32 to vector<1x16x16xf32>
    %48 = arith.mulf %47, %46 : vector<1x16x16xf32>
    %c1_i32_20 = arith.constant 1 : i32
    %49 = tpu.dynamic_rotate %8 by %c1_i32_20 dim 2 : vector<1x16x16xf32>, i32 -> vector<1x16x16xf32>
    %c1_i32_21 = arith.constant 1 : i32
    %50 = vector.broadcast %c1_i32_21 : i32 to vector<1x16x16xi32>
    %51 = arith.cmpi sge, %10, %50 : vector<1x16x16xi32>
    %cst_22 = arith.constant 0.000000e+00 : f32
    %52 = vector.broadcast %cst_22 : f32 to vector<1x16x16xf32>
    %53 = arith.select %51, %49, %52 : vector<1x16x16xi1>, vector<1x16x16xf32>
    %54 = vector.broadcast %14 : f32 to vector<1x16x16xf32>
    %55 = arith.mulf %54, %53 : vector<1x16x16xf32>
    %56 = vector.broadcast %15 : f32 to vector<1x16x16xf32>
    %57 = arith.mulf %56, %8 : vector<1x16x16xf32>
    %c15_i32_23 = arith.constant 15 : i32
    %58 = tpu.dynamic_rotate %8 by %c15_i32_23 dim 2 : vector<1x16x16xf32>, i32 -> vector<1x16x16xf32>
    %c15_i32_24 = arith.constant 15 : i32
    %59 = vector.broadcast %c15_i32_24 : i32 to vector<1x16x16xi32>
    %60 = arith.cmpi slt, %10, %59 : vector<1x16x16xi32>
    %cst_25 = arith.constant 0.000000e+00 : f32
    %61 = vector.broadcast %cst_25 : f32 to vector<1x16x16xf32>
    %62 = arith.select %60, %58, %61 : vector<1x16x16xi1>, vector<1x16x16xf32>
    %63 = vector.broadcast %16 : f32 to vector<1x16x16xf32>
    %64 = arith.mulf %63, %62 : vector<1x16x16xf32>
    %c15_i32_26 = arith.constant 15 : i32
    %65 = tpu.dynamic_rotate %8 by %c15_i32_26 dim 1 : vector<1x16x16xf32>, i32 -> vector<1x16x16xf32>
    %c1_i32_27 = arith.constant 1 : i32
    %66 = tpu.dynamic_rotate %65 by %c1_i32_27 dim 2 : vector<1x16x16xf32>, i32 -> vector<1x16x16xf32>
    %c15_i32_28 = arith.constant 15 : i32
    %67 = vector.broadcast %c15_i32_28 : i32 to vector<1x16x16xi32>
    %68 = arith.cmpi slt, %9, %67 : vector<1x16x16xi32>
    %c1_i32_29 = arith.constant 1 : i32
    %69 = vector.broadcast %c1_i32_29 : i32 to vector<1x16x16xi32>
    %70 = arith.cmpi sge, %10, %69 : vector<1x16x16xi32>
    %71 = arith.andi %68, %70 : vector<1x16x16xi1>
    %cst_30 = arith.constant 0.000000e+00 : f32
    %72 = vector.broadcast %cst_30 : f32 to vector<1x16x16xf32>
    %73 = arith.select %71, %66, %72 : vector<1x16x16xi1>, vector<1x16x16xf32>
    %74 = vector.broadcast %17 : f32 to vector<1x16x16xf32>
    %75 = arith.mulf %74, %73 : vector<1x16x16xf32>
    %c15_i32_31 = arith.constant 15 : i32
    %76 = tpu.dynamic_rotate %8 by %c15_i32_31 dim 1 : vector<1x16x16xf32>, i32 -> vector<1x16x16xf32>
    %c15_i32_32 = arith.constant 15 : i32
    %77 = vector.broadcast %c15_i32_32 : i32 to vector<1x16x16xi32>
    %78 = arith.cmpi slt, %9, %77 : vector<1x16x16xi32>
    %cst_33 = arith.constant 0.000000e+00 : f32
    %79 = vector.broadcast %cst_33 : f32 to vector<1x16x16xf32>
    %80 = arith.select %78, %76, %79 : vector<1x16x16xi1>, vector<1x16x16xf32>
    %81 = vector.broadcast %18 : f32 to vector<1x16x16xf32>
    %82 = arith.mulf %81, %80 : vector<1x16x16xf32>
    %c15_i32_34 = arith.constant 15 : i32
    %83 = tpu.dynamic_rotate %8 by %c15_i32_34 dim 1 : vector<1x16x16xf32>, i32 -> vector<1x16x16xf32>
    %c15_i32_35 = arith.constant 15 : i32
    %84 = tpu.dynamic_rotate %83 by %c15_i32_35 dim 2 : vector<1x16x16xf32>, i32 -> vector<1x16x16xf32>
    %c15_i32_36 = arith.constant 15 : i32
    %85 = vector.broadcast %c15_i32_36 : i32 to vector<1x16x16xi32>
    %86 = arith.cmpi slt, %9, %85 : vector<1x16x16xi32>
    %c15_i32_37 = arith.constant 15 : i32
    %87 = vector.broadcast %c15_i32_37 : i32 to vector<1x16x16xi32>
    %88 = arith.cmpi slt, %10, %87 : vector<1x16x16xi32>
    %89 = arith.andi %86, %88 : vector<1x16x16xi1>
    %cst_38 = arith.constant 0.000000e+00 : f32
    %90 = vector.broadcast %cst_38 : f32 to vector<1x16x16xf32>
    %91 = arith.select %89, %84, %90 : vector<1x16x16xi1>, vector<1x16x16xf32>
    %92 = vector.broadcast %19 : f32 to vector<1x16x16xf32>
    %93 = arith.mulf %92, %91 : vector<1x16x16xf32>
    %94 = arith.addf %30, %48 : vector<1x16x16xf32>
    %95 = arith.addf %94, %57 : vector<1x16x16xf32>
    %96 = arith.addf %95, %75 : vector<1x16x16xf32>
    %97 = arith.addf %96, %93 : vector<1x16x16xf32>
    %98 = arith.addf %37, %55 : vector<1x16x16xf32>
    %99 = arith.addf %98, %64 : vector<1x16x16xf32>
    %100 = arith.addf %99, %82 : vector<1x16x16xf32>
    %101 = arith.addf %97, %100 : vector<1x16x16xf32>
    %102 = math.absf %101 : vector<1x16x16xf32>
    %103 = vector.shape_cast %102 : vector<1x16x16xf32> to vector<1x1x16x16xf32>
    %cst_39 = arith.constant dense<0xFF800000> : vector<1xf32>
    %104 = vector.multi_reduction <maximumf>, %103, %cst_39 [1, 2, 3] : vector<1x1x16x16xf32> to vector<1xf32>
    %105 = vector.shape_cast %104 : vector<1xf32> to vector<1x1x1x1xf32>
    %106 = vector.extract %105[0, 0, 0, 0] : f32 from vector<1x1x1x1xf32>
    %107 = vector.broadcast %106 : f32 to vector<1x1x1xf32>
    %c0_40 = arith.constant 0 : index
    %c0_41 = arith.constant 0 : index
    %c0_42 = arith.constant 0 : index
    %108 = vector.load %arg4[%c0_40, %c0_41, %c0_42] : memref<1x1x1xf32, #tpu.memory_space<vmem>>, vector<1x1x1xf32>
    tpu.vector_store %arg4[%c0_40, %c0_41, %c0_42], %107 {strides = array<i32>} : memref<1x1x1xf32, #tpu.memory_space<vmem>>, vector<1x1x1xf32>,
    %c0_43 = arith.constant 0 : index
    %c0_44 = arith.constant 0 : index
    %c0_45 = arith.constant 0 : index
    %109 = vector.load %arg3[%c0_43, %c0_44, %c0_45] : memref<1x16x16xf32, #tpu.memory_space<vmem>>, vector<1x16x16xf32>
    tpu.vector_store %arg3[%c0_43, %c0_44, %c0_45], %101 {strides = array<i32>} : memref<1x16x16xf32, #tpu.memory_space<vmem>>, vector<1x16x16xf32>,
    return
  }
  func.func @transform_0(%arg0: i32) -> i32 {
    %c0_i32 = arith.constant 0 : i32
    %c0_i32_0 = arith.constant 0 : i32
    return %c0_i32 : i32
  }
  func.func @transform_1(%arg0: i32) -> (i32, i32, i32, i32) {
    %c0_i32 = arith.constant 0 : i32
    %c0_i32_0 = arith.constant 0 : i32
    %c0_i32_1 = arith.constant 0 : i32
    %c0_i32_2 = arith.constant 0 : i32
    return %arg0, %c0_i32, %c0_i32_0, %c0_i32_1 : i32, i32, i32, i32
  }
  func.func @transform_2(%arg0: i32) -> (i32, i32, i32) {
    %c0_i32 = arith.constant 0 : i32
    %c0_i32_0 = arith.constant 0 : i32
    %c0_i32_1 = arith.constant 0 : i32
    return %arg0, %c0_i32, %c0_i32_0 : i32, i32, i32
  }
  func.func @transform_3(%arg0: i32) -> (i32, i32, i32) {
    %c0_i32 = arith.constant 0 : i32
    %c0_i32_0 = arith.constant 0 : i32
    %c0_i32_1 = arith.constant 0 : i32
    return %arg0, %c0_i32, %c0_i32_0 : i32, i32, i32
  }
  func.func @transform_4(%arg0: i32) -> (i32, i32, i32) {
    %c0_i32 = arith.constant 0 : i32
    %c0_i32_0 = arith.constant 0 : i32
    %c0_i32_1 = arith.constant 0 : i32
    return %arg0, %c0_i32, %c0_i32_0 : i32, i32, i32
  }
}

</mosaic_0001>

<bundles_post_ra>
// kernel: tpu_custom_call.1
= control target key start
LH: loop header
LB: loop body
LE: loop exit
PB: predicated region body
PF: predicated region fallthrough
CT: control target
= control target key end

     0   :  { %10 = vsyncpa [#allocation5], 0  ;;  %s1279_s0 = inlined_call_operand.hbm [shape: f32[9], index: 0, kind: input, shape index: {}]   ;;  %s1280_s1 = inlined_call_operand.hbm [shape: f32[2,4,16,16], index: 1, kind: input, shape index: {}]   ;;  %s1281_s2 = inlined_call_operand.hbm [shape: f32[2,16,16], index: 2, kind: output, shape index: {0}]   ;;  %s1282_s3 = inlined_call_operand.vmem [shape: f32[2,1,1], index: 3, kind: output, shape index: {1}]   ;;  %s1283_s4 = inlined_call_operand.vmem [shape: f32[2,1,1], index: 4, kind: output, shape index: {2}]  }
   0x1   :  { %11 = vsyncpa [#allocation3], 0 }
   0x2   :  { %13 = vsyncpa [#allocation3 + $0x1], 0 }
   0x3   :  { %14 = vsyncpa [#allocation4], 0 }
   0x4   :  { %16 = vsyncpa [#allocation4 + $0x1], 0  ;;  %s884_s15 = smov 0   ;;  %s886_s16 = smov 0  }
   0x5   :  { %s888_s17 = smov 0   ;;  %s890_s18 = smov 0  }
   0x6 LB: > { %s905_s19 = sadd.s32 4294967295, %s847_s18   ;;  %s640_s20 = sadd.s32 4294967294, %s847_s18   ;;  %s847_s18 = sphi %s890_s18, %s1307_s18   ;;  %s843_s17 = sphi %s888_s17, %s1306_s17   ;;  %s839_s16 = sphi %s886_s16, %s1305_s16   ;;  %s835_s15 = sphi %s884_s15, %s1304_s15  }
   0x7   : > { %s909_s21 = sadd.s32 1, %s847_s18   ;;  %s50_s22 = sadd.s32 1, %s843_s17 }
   0x8   : > { %s47_s23 = ssub.s32 %s847_s18, %s909_s21  ;;  %p57_p0 = scmp.ne.s32.totalorder %s843_s17, %s839_s16 }
   0x9   : > { %p48_p1 = scmp.eq.s32.totalorder %s47_s23, 0  ;;  %p58_p2 = scmp.eq.s32.totalorder %s847_s18, 0 }
   0xa   : > { %p63_p3 = scmp.ne.s32.totalorder %s839_s16, %s835_s15  ;;  %p1284_p4 = scmp.eq.s32.totalorder %s905_s19, 0 }
   0xb   : > { %s921_s24 = scalar_select %p48_p1, %s843_s17, %s50_s22  }
   0xc   : > { %p923_p5 = por %p58_p2, %p57_p0  ;;  %p929_p6 = por %p1284_p4, %p63_p3 }
   0xd   : > { %p87_p7 = scmp.eq.s32.totalorder %s905_s19, 1  ;;  %p93_p8 = scmp.eq.s32.totalorder %s640_s20, 1 }
   0xe   : > { %s1288_s26 = scalar_select %p929_p6, 1, 0 }
   0xf   : > { %p641_p9 = scmp.ge.s32.totalorder %s847_s18, 1  ;;  %p152_p10 = scmp.lt.s32.totalorder %s847_s18, 3 }
  0x10   : > { %p936_p11 = por %p87_p7, %p57_p0  ;;  %p940_p12 = por %p93_p8, %p63_p3 }
  0x11   : > { %p944_p13 = pnand %p641_p9, %p152_p10  ;;  %p691_p4 = scmp.lt.s32.totalorder %s847_s18, 2 }
  0x12   : > { %s1289_s27 = scalar_select %p936_p11, 1, 0 }
  0x13   : > { %s1290_s28 = scalar_select %p940_p12, 1, 0 }
  0x14   : > { %p678_p2 = pneg %p944_p13  ;;  %s174_s30 = sand.u32 1, %s843_s17  }
  0x15   : > { %s664_s5 = sshll.u32 %s847_s18, 10  ;;  %p1292_p6 = scmp.eq.s32.totalorder %s905_s19, 0 }
  0x16   : > { %p958_p7 = pnand %p691_p4, %p923_p5  ;;  %s644_s7 = sshll.u32 %s174_s30, 6 }
  0x17   : > { %p679_p0 = pnand %p678_p2, %p1292_p6  ;;  %s734_s10 = scalar_lea.hbm %s1279_s0, 16 }
  0x18   : > { %p735_p3 = scmp.ne.s32.totalorder %s1279_s0, %s734_s10  ;;  %p741_p6 = scmp.lt.u32.totalorder %s734_s10, %s1279_s0 }
  0x19   : > { %p736_p8 = pneg %p679_p0 }
  0x1b   : > { %p737_p9 = pnand %p736_p8, %p735_p3 }
  0x1d   : > { %p738_p10 = pneg %p737_p9 }
  0x1f   : > { %p743_p4 = pnand %p741_p6, %p738_p10 }
  0x21   : > { %746 = shalt.err (!%p743_p4)
}
  0x22   : > { %s849_s20 = smov [#allocation2]   ;;  %s977_s9 = scalar_lea.hbm %s1280_s1, %s664_s5 }
  0x23   : > { %681 = dma.hbm_to_smem (!%p679_p0), %s1279_s0, 16, %s849_s20, [#allocation5]  }
  0x24   : > { %s178_s11 = scalar_lea.vmem [#allocation6], %s644_s7  ;;  %s981_s12 = scalar_lea.sflag [#allocation3], %s174_s30 }
  0x25   : > { %s185_s10 = sshll.u32 %s178_s11, 4  ;;  %s747_s13 = scalar_lea.hbm %s977_s9, 1024  ;;  %s979_s10 = int_to_ptr.vmem [resolvable:$true] %s185_s10 }
  0x26   : > { %p748_p5 = scmp.ne.s32.totalorder %s977_s9, %s747_s13  ;;  %p749_p2 = pneg %p958_p7 }
  0x27   : > { %s752_s20 = scalar_lea.hbm %s1280_s1, 2048  ;;  %p753_p8 = scmp.lt.u32.totalorder %s977_s9, %s1280_s1 }
  0x28   : > { %p750_p0 = pnand %p749_p2, %p748_p5  ;;  %p754_p9 = scmp.lt.u32.totalorder %s752_s20, %s747_s13 }
  0x29   : > { %p756_p6 = scmp.lt.u32.totalorder %s747_s13, %s977_s9 }
  0x2a   : > { %p751_p3 = pneg %p750_p0  ;;  %p755_p10 = por %p754_p9, %p753_p8 }
  0x2c   : > { %p757_p4 = por %p756_p6, %p755_p10 }
  0x2e   : > { %p758_p1 = pnand %p757_p4, %p751_p3 }
  0x30   : > { %761 = shalt.err (!%p758_p1)
}
  0x31   : > { %s762_s30 = scalar_lea.vmem %s979_s10, 1024  ;;  %s850_s7 = smov [#allocation6]  }
  0x32   : > { %p763_p5 = scmp.ne.s32.totalorder %s979_s10, %s762_s30  ;;  %s767_s25 = sshll.u32 %s850_s7, 4  ;;  %s768_s25 = int_to_ptr.vmem [resolvable:$false] %s767_s25 }
  0x33   : > { %s769_s8 = scalar_lea.vmem %s768_s25, 2048  ;;  %p770_p11 = scmp.lt.s32.totalorder %s979_s10, %s768_s25 }
  0x34   : > { %p765_p0 = pnand %p763_p5, %p749_p2  ;;  %p771_p8 = scmp.lt.s32.totalorder %s769_s8, %s762_s30 }
  0x36   : > { %p766_p12 = pneg %p765_p0  ;;  %p772_p9 = por %p771_p8, %p770_p11 }
  0x38   : > { %p773_p10 = pnand %p772_p9, %p766_p12 }
  0x3a   : > { %776 = shalt.err (!%p773_p10)
}
  0x3b   : > { %s851_s11 = smov 128   ;;  %s852_s13 = smov 8  }
  0x3c   : > { %685 = dma.hbm_to_vmem [thread:$0]  (!%p958_p7), %s977_s9, 1024, %s979_s10, %s981_s12, %s851_s11, %s851_s11, %s852_s13  }
  0x3d   : > { %197 = sbr.rel (%p944_p13) target bundleno = 672 (0x2a0), region = 28  ;;  %p1294_p1 = scmp.eq.s32.totalorder (!%p944_p13), %s905_s19, 0 }
  0x44   : > { %822 = dma.done.wait (%p1294_p1), [#allocation5], 16   ;;  %p1295_p2 = pmov %p1294_p1 }
  0x45   : > { %s1016_s5 = sand.u32 1, %s839_s16   ;;  %p1296_p11 = scmp.ne.s32.totalorder %s1288_s26, 0 }
  0x46   : > { %824 = vsyncadd (%p1295_p2), [#allocation5], 4294967280  ;;  %s649_s14 = sshll.u32 %s1016_s5, 6  ;;  %s204_s20 = scalar_lea.sflag [#allocation3], %s1016_s5 }
  0x47   : > { %s207_s22 = scalar_lea.vmem [#allocation6], %s649_s14 }
  0x48   : > { %826 = dma.done.wait (%p1296_p11), %s204_s20, 1024  }
  0x49   : > { %828 = vsyncadd (%p1296_p11), %s204_s20, 4294966272 }
  0x4a   : > { %212 = sfence }
  0x4b   : > { %v1024_v0 = vld [vmem:[%s207_s22] sm:$0xff]  ;;  %v1026_v1 = vld [vmem:[%s207_s22 + $0x10] sm:$0xff]  ;;  %vm253_vm0 = vcmask 130048   ;;  %v297_v3 = vlaneseq  ;;  %v1038_v8 = vld [vmem:[%s207_s22 + $0x8] sm:$0xff]  ;;  %s853_s26 = smov 16   ;;  %vm316_vm3 = vcmask 1047680  }
  0x4c   : > { %v1028_v2 = vld [vmem:[%s207_s22 + $0x20] sm:$0xff]  ;;  %v1030_v4 = vld [vmem:[%s207_s22 + $0x30] sm:$0xff]  ;;  %v283_v5 = vsel %vm253_vm0, %v1024_v0, 0.0  ;;  %v284_v6 = vsel %vm253_vm0, %v1026_v1, 0.0  ;;  %v1040_v9 = vld [vmem:[%s207_s22 + $0x18] sm:$0xff]  ;;  %v290_v13 = vsel %vm253_vm0, %v1038_v8, 0.0 }
  0x4d   : > { %v286_v7 = vsel %vm253_vm0, %v1028_v2, 0.0  ;;  %v285_v10 = vadd.f32 %v284_v6, %v283_v5  ;;  %v1042_v11 = vld [vmem:[%s207_s22 + $0x28] sm:$0xff]  ;;  %v1044_v12 = vld [vmem:[%s207_s22 + $0x38] sm:$0xff]  ;;  %v291_v14 = vsel %vm253_vm0, %v1040_v9, 0.0  ;;  %v288_v15 = vsel %vm253_vm0, %v1030_v4, 0.0  ;;  %s854_s29 = smov 113  }
  0x4e   : > { %v292_v16 = vadd.f32 %v291_v14, %v290_v13  ;;  %v293_v17 = vsel %vm253_vm0, %v1042_v11, 0.0  ;;  %v295_v19 = vsel %vm253_vm0, %v1044_v12, 0.0  ;;  %v1057_v20 = vshrl.u32 %v297_v3, 7  ;;  %s855_s6 = smov 127   ;;  %s1137_s9 = sld [smem:[#allocation2 + $0x1]] }
  0x4f   : > { %v287_v18 = vadd.f32 %v286_v7, %v285_v10  ;;  %v254_v56 = vsel %vm253_vm0, %v1024_v0, -inf  ;;  %v255_v57 = vsel %vm253_vm0, %v1026_v1, -inf  ;;  %v256_v58 = vsel %vm253_vm0, %v1028_v2, -inf  ;;  %s1139_s10 = sld [smem:[#allocation2 + $0x3]]  ;;  %s1144_s12 = sld [smem:[#allocation2]] }
  0x50   : > { %v294_v21 = vadd.f32 %v293_v17, %v292_v16  ;;  %vm313_vm1 = vcmp.lt.s32.totalorder %v1057_v20, 1  ;;  %vm407_vm2 = vcmp.lt.s32.totalorder %v1057_v20, 7  ;;  %v258_v59 = vsel %vm253_vm0, %v1030_v4, -inf  ;;  %s1146_s23 = sld [smem:[#allocation2 + $0x2]]  ;;  %s1148_s30 = sld [smem:[#allocation2 + $0x4]] }
  0x51   : > { %v1059_v22 = vadd.f32 %v288_v15, %v287_v18  ;;  %v261_v60 = vsel %vm253_vm0, %v1038_v8, -inf  ;;  %v262_v61 = vsel %vm253_vm0, %v1040_v9, -inf  ;;  %v263_v62 = vsel %vm253_vm0, %v1042_v11, -inf  ;;  %s1151_s7 = sld [smem:[#allocation2 + $0x5]]  ;;  %s1154_s25 = sld [smem:[#allocation2 + $0x7]] }
  0x52   : > { %v1061_v23 = vadd.f32 %v295_v19, %v294_v21  ;;  %v265_v63 = vsel %vm253_vm0, %v1044_v12, -inf  ;;  %v257_v0 = vmax.f32 %v254_v56, %v256_v58  ;;  %v259_v1 = vmax.f32 %v255_v57, %v258_v59  ;;  %s1156_s8 = sld [smem:[#allocation2 + $0x6]]  ;;  %s1182_s11 = sld [smem:[#allocation2 + $0x8]] }
  0x53   : > { %366 = vrot.lane.b32.xlu1 %v1059_v22, %s853_s26  ;;  %v311_v24 = vrot.slane %v1059_v22, 7  ;;  %v405_v27 = vrot.slane %v1059_v22, 1  ;;  %v264_v5 = vmax.f32 %v261_v60, %v263_v62  ;;  %v266_v6 = vmax.f32 %v262_v61, %v265_v63  ;;  %s650_s13 = sshll.u32 %s1016_s5, 4  ;;  %s665_s20 = sshll.u32 %s905_s19, 8 }
  0x54   : > { %v312_v25 = vrot.slane %v1061_v23, 7  ;;  %v406_v28 = vrot.slane %v1061_v23, 1  ;;  %v260_v2 = vmax.f32 %v257_v0, %v259_v1  ;;  %v1142_v9 = vand.u32 127, %v297_v3  ;;  %s228_s14 = scalar_lea.vmem [#allocation7], %s650_s13  ;;  %p1301_p13 = scmp.ne.s32.totalorder %s1289_s27, 0 }
  0x55   : > { %v267_v7 = vmax.f32 %v264_v5, %v266_v6  ;;  %vm329_vm4 = vcmp.ge.s32.totalorder %v1057_v20, 1  ;;  %v349_v17 = vstv %s1137_s9  ;;  %v388_v18 = vstv %s1139_s10  ;;  %s511_s22 = sshll.u32 %s228_s14, 4  ;;  %s492_s9 = scalar_lea.sflag [#allocation4], %s1016_s5  ;;  %s1227_s22 = int_to_ptr.vmem [resolvable:$true] %s511_s22 }
  0x56   : > { %v1068_v26 = vsel %vm313_vm1, %v312_v25, %v311_v24  ;;  %v1077_v29 = vsel %vm313_vm1, %v311_v24, %v312_v25  ;;  %v1079_v30 = vsel %vm407_vm2, %v406_v28, %v405_v27  ;;  %v1085_v31 = vsel %vm407_vm2, %v405_v27, %v406_v28  ;;  %s777_s10 = scalar_lea.vmem %s1227_s22, 256 }
  0x57   : > { %369 = vrot.lane.b32.xlu1 %v1061_v23, %s853_s26  ;;  %317 = vrot.lane.b32.xlu0 %v1068_v26, %s853_s26  ;;  %v268_v4 = vsel %vm253_vm0, %v260_v2, -inf  ;;  %v269_v10 = vsel %vm253_vm0, %v267_v7, -inf  ;;  %vm331_vm5 = vcmp.ge.s32.totalorder %v1142_v9, 1  ;;  %v347_v3 = vsel %vm329_vm4, %v1068_v26, 0.0  ;;  %p778_p12 = scmp.ne.s32.totalorder %s1227_s22, %s777_s10 }
  0x58   : > { %v270_v8 = vmax.f32 %v268_v4, %v269_v10  ;;  %vm1161_vm6 = vmand %vm329_vm4, %vm331_vm5  ;;  %vm352_vm7 = vcmp.lt.s32.totalorder %v1142_v9, 15  ;;  %v299_v24 = vadd.s32 8, %v1057_v20  ;;  %v344_v25 = vstv %s1144_s12  ;;  %s856_s12 = smov [#allocation7]  }
  0x59   : > { %vm1172_vm8 = vmand %vm329_vm4, %vm352_vm7  ;;  %v363_v27 = vstv %s1146_s23  ;;  %v391_v28 = vstv %s1148_s30  ;;  %p779_p7 = pnand %p778_p12, %p1301_p13  ;;  %s781_s23 = sshll.u32 %s856_s12, 4  ;;  %s782_s23 = int_to_ptr.vmem [resolvable:$false] %s781_s23 }
  0x5a   : > { %vm423_vm9 = vcmp.lt.s32.totalorder %v299_v24, 15  ;;  %s783_s30 = scalar_lea.vmem %s782_s23, 512  ;;  %p784_p6 = scmp.lt.s32.totalorder %s1227_s22, %s782_s23 }
  0x5b   : > { %320 = vrot.lane.b32.xlu0 %v1077_v29, %s853_s26  ;;  %413 = vrot.lane.b32.xlu1 %v1079_v30, %s853_s26  ;;  %vm425_vm10 = vmand %vm423_vm9, %vm331_vm5  ;;  %v440_v1 = vsel %vm423_vm9, %v1079_v30, 0.0  ;;  %p780_p3 = pneg %p779_p7  ;;  %p785_p4 = scmp.lt.s32.totalorder %s783_s30, %s777_s10 }
  0x5c   : > { %vm445_vm11 = vmand %vm423_vm9, %vm352_vm7 }
  0x5d   : > { %p786_p5 = por %p785_p4, %p784_p6 }
  0x5f   : > { %410 = vrot.lane.b32.xlu0 %v1085_v31, %s853_s26  ;;  %p787_p0 = pnand %p786_p5, %p780_p3 }
  0xc5   : > { %v367_v32 = vpop.permute.xlu1 %366 }
  0xc6   : > { %v368_v33 = vsel %vm316_vm3, %v367_v32, %v1059_v22  ;;  %v350_v32 = vmul.f32 %v349_v17, %v347_v3 }
  0xc7   : > { %372 = vrot.lane.b32.xlu0 %v368_v33, %s853_s26 }
  0xc9   : > { %v370_v34 = vpop.permute.xlu1 %369  ;;  %v318_v35 = vpop.permute.xlu0 %317 }
  0xca   : > { %v371_v36 = vsel %vm316_vm3, %v370_v34, %v1061_v23  ;;  %v319_v37 = vsel %vm316_vm3, %v318_v35, %v1068_v26 }
  0xcb   : > { %374 = vrot.lane.b32.xlu1 %v371_v36, %s853_s26  ;;  %323 = vrot.lane.b32.xlu0 %v319_v37, %s853_s26  ;;  %v351_v36 = vmul.f32 %v349_v17, %v1077_v29  ;;  %v402_v37 = vstv %s1151_s7 }
  0xcd   : > { %v321_v38 = vpop.permute.xlu0 %320  ;;  %v414_v39 = vpop.permute.xlu1 %413 }
  0xce   : > { %v322_v40 = vsel %vm316_vm3, %v321_v38, %v1077_v29  ;;  %v415_v41 = vsel %vm316_vm3, %v414_v39, %v1079_v30 }
  0xcf   : > { %325 = vrot.lane.b32.xlu1 %v322_v40, %s853_s26 }
  0xd1   : > { %v411_v42 = vpop.permute.xlu0 %410 }
  0xd2   : > { %v412_v43 = vsel %vm316_vm3, %v411_v42, %v1085_v31  ;;  %v392_v42 = vmul.f32 %v391_v28, %v1059_v22 }
  0xd3   : > { %416 = vrot.lane.b32.xlu0 %v412_v43, %s853_s26  ;;  %418 = vrot.lane.b32.xlu1 %v415_v41, %s853_s26  ;;  %v441_v43 = vstv %s1154_s25 }
  0xd4   : > { %v442_v58 = vmul.f32 %v441_v43, %v1085_v31 }
 0x139   : > { %v373_v44 = vpop.permute.xlu0 %372 }
 0x13a   : > { %v376_v45 = vsel %vm316_vm3, %v373_v44, %v1059_v22 }
 0x13b   : > { %380 = vrot.lane.b32.xlu0 %v376_v45, %s854_s29 }
 0x13d   : > { %v375_v46 = vpop.permute.xlu1 %374  ;;  %v324_v47 = vpop.permute.xlu0 %323 }
 0x13e   : > { %v377_v48 = vsel %vm316_vm3, %v375_v46, %v1061_v23  ;;  %v327_v49 = vsel %vm316_vm3, %v324_v47, %v1068_v26 }
 0x13f   : > { %382 = vrot.lane.b32.xlu1 %v377_v48, %s854_s29  ;;  %394 = vrot.lane.b32.xlu0 %v376_v45, %s855_s6  ;;  %v436_v45 = vstv %s1156_s8 }
 0x141   : > { %v326_v50 = vpop.permute.xlu1 %325 }
 0x142   : > { %v328_v51 = vsel %vm316_vm3, %v326_v50, %v1077_v29  ;;  %v393_v50 = vmul.f32 %v391_v28, %v1061_v23  ;;  %v454_v23 = vstv %s1182_s11 }
 0x143   : > { %396 = vrot.lane.b32.xlu1 %v377_v48, %s855_s6  ;;  %336 = vrot.lane.b32.xlu0 %v327_v49, %s854_s29 }
 0x145   : > { %v417_v52 = vpop.permute.xlu0 %416  ;;  %v419_v54 = vpop.permute.xlu1 %418 }
 0x146   : > { %v420_v53 = vsel %vm316_vm3, %v417_v52, %v1085_v31  ;;  %v421_v55 = vsel %vm316_vm3, %v419_v54, %v1079_v30 }
 0x147   : > { %338 = vrot.lane.b32.xlu1 %v328_v51, %s854_s29  ;;  %355 = vrot.lane.b32.xlu0 %v327_v49, %s855_s6 }
 0x14b   : > { %357 = vrot.lane.b32.xlu1 %v328_v51, %s855_s6  ;;  %428 = vrot.lane.b32.xlu0 %v420_v53, %s854_s29 }
 0x14f   : > { %430 = vrot.lane.b32.xlu1 %v421_v55, %s854_s29  ;;  %446 = vrot.lane.b32.xlu0 %v420_v53, %s855_s6 }
 0x153   : > { %448 = vrot.lane.b32.xlu1 %v421_v55, %s855_s6  ;;  %s1225_s6 = scalar_lea.hbm %s1281_s2, %s665_s20 }
 0x16e   : > { %271 = vmax.xlane.f32.xlu0 %v270_v8 }
 0x1ad   : > { %v381_v13 = vpop.permute.xlu0 %380 }
 0x1ae   : > { %v386_v19 = vsel %vm331_vm5, %v381_v13, 0.0  ;;  %v443_v13 = vmul.f32 %v441_v43, %v440_v1 }
 0x1af   : > { %v389_v33 = vmul.f32 %v388_v18, %v386_v19 }
 0x1b1   : > { %v383_v11 = vpop.permute.xlu1 %382  ;;  %v395_v12 = vpop.permute.xlu0 %394  ;;  %v465_v29 = vadd.f32 %v389_v33, %v350_v32 }
 0x1b2   : > { %v400_v20 = vsel %vm352_vm7, %v395_v12, 0.0  ;;  %v387_v39 = vsel %vm331_vm5, %v383_v11, 0.0 }
 0x1b3   : > { %v403_v46 = vmul.f32 %v402_v37, %v400_v20  ;;  %v390_v51 = vmul.f32 %v388_v18, %v387_v39 }
 0x1b5   : > { %v397_v14 = vpop.permute.xlu1 %396  ;;  %v337_v16 = vpop.permute.xlu0 %336  ;;  %v467_v59 = vadd.f32 %v465_v29, %v403_v46  ;;  %v466_v0 = vadd.f32 %v390_v51, %v351_v36 }
 0x1b6   : > { %v342_v26 = vsel %vm1161_vm6, %v337_v16, 0.0  ;;  %v401_v52 = vsel %vm352_vm7, %v397_v14, 0.0 }
 0x1b7   : > { %v345_v40 = vmul.f32 %v344_v25, %v342_v26  ;;  %v404_v60 = vmul.f32 %v402_v37, %v401_v52  ;;  %v469_v31 = vadd.f32 %v467_v59, %v442_v58 }
 0x1b9   : > { %v339_v34 = vpop.permute.xlu1 %338  ;;  %v356_v35 = vpop.permute.xlu0 %355  ;;  %v468_v8 = vadd.f32 %v466_v0, %v404_v60 }
 0x1ba   : > { %v361_v38 = vsel %vm1172_vm8, %v356_v35, 0.0  ;;  %v343_v44 = vsel %vm331_vm5, %v339_v34, 0.0 }
 0x1bb   : > { %v364_v41 = vmul.f32 %v363_v27, %v361_v38  ;;  %v346_v54 = vmul.f32 %v344_v25, %v343_v44  ;;  %v470_v17 = vadd.f32 %v468_v8, %v443_v13 }
 0x1bd   : > { %v457_v47 = vadd.f32 %v364_v41, %v345_v40  ;;  %v358_v48 = vpop.permute.xlu1 %357  ;;  %v429_v49 = vpop.permute.xlu0 %428 }
 0x1be   : > { %v362_v22 = vsel %vm352_vm7, %v358_v48, 0.0  ;;  %v434_v53 = vsel %vm331_vm5, %v429_v49, 0.0 }
 0x1bf   : > { %v365_v55 = vmul.f32 %v363_v27, %v362_v22  ;;  %v459_v56 = vadd.f32 %v457_v47, %v392_v42  ;;  %v437_v57 = vmul.f32 %v436_v45, %v434_v53 }
 0x1c1   : > { %v458_v61 = vadd.f32 %v365_v55, %v346_v54  ;;  %v431_v62 = vpop.permute.xlu1 %430  ;;  %v447_v63 = vpop.permute.xlu0 %446  ;;  %v461_v2 = vadd.f32 %v459_v56, %v437_v57 }
 0x1c2   : > { %v435_v5 = vsel %vm425_vm10, %v431_v62, 0.0  ;;  %v452_v6 = vsel %vm352_vm7, %v447_v63, 0.0 }
 0x1c3   : > { %v460_v7 = vadd.f32 %v458_v61, %v393_v50  ;;  %v438_v4 = vmul.f32 %v436_v45, %v435_v5  ;;  %v455_v10 = vmul.f32 %v454_v23, %v452_v6 }
 0x1c5   : > { %v463_v11 = vadd.f32 %v461_v2, %v455_v10  ;;  %v449_v12 = vpop.permute.xlu1 %448  ;;  %v462_v30 = vadd.f32 %v460_v7, %v438_v4 }
 0x1c6   : > { %v453_v3 = vsel %vm445_vm11, %v449_v12, 0.0 }
 0x1c7   : > { %v471_v14 = vadd.f32 %v469_v31, %v463_v11  ;;  %v456_v15 = vmul.f32 %v454_v23, %v453_v3 }
 0x1c9   : > { %489 = vst.msk [vmem:[%s228_s14] sm:$0xff] %vm253_vm0, %v471_v14  ;;  %v464_v16 = vadd.f32 %v462_v30, %v456_v15  ;;  %v473_v19 = vand.u32 2147483647, %v471_v14 }
 0x1cb   : > { %v472_v18 = vadd.f32 %v470_v17, %v464_v16  ;;  %v475_v21 = vsel %vm253_vm0, %v473_v19, -inf }
 0x1cd   : > { %490 = vst.msk [vmem:[%s228_s14 + $0x8] sm:$0xff] %vm253_vm0, %v472_v18  ;;  %v474_v9 = vand.u32 2147483647, %v472_v18 }
 0x1cf   : > { %v476_v24 = vsel %vm253_vm0, %v474_v9, -inf }
 0x1d0   : > { %v477_v25 = vmax.f32 %v475_v21, %v476_v24 }
 0x1d2   : > { %478 = vmax.xlane.f32.xlu1 %v477_v25 }
 0x1fb   : > { %v272_v26 = vpop.xlane.xlu0 %271 }
 0x1fc   : > { %v273_v27 = vrot.slane %v272_v26, 4 }
 0x1fe   : > { %v274_v28 = vmax.f32 %v272_v26, %v273_v27 }
 0x200   : > { %v275_v32 = vrot.slane %v274_v28, 2 }
 0x202   : > { %v276_v33 = vmax.f32 %v274_v28, %v275_v32 }
 0x204   : > { %v277_v34 = vrot.slane %v276_v33, 1 }
 0x206   : > { %v278_v35 = vmax.f32 %v276_v33, %v277_v34 }
 0x208   : > { %666 = vpush %v278_v35 }
 0x209   : > { %790 = shalt.err (!%p787_p0)
}
 0x20a   : > { %s791_s7 = scalar_lea.hbm %s1225_s6, 256  ;;  %s795_s11 = scalar_lea.hbm %s1281_s2, 512 }
 0x20b   : > { %p792_p8 = scmp.ne.s32.totalorder %s1225_s6, %s791_s7  ;;  %p796_p1 = scmp.lt.u32.totalorder %s1225_s6, %s1281_s2 }
 0x20c   : > { %p797_p2 = scmp.lt.u32.totalorder %s795_s11, %s791_s7  ;;  %p799_p12 = scmp.lt.u32.totalorder %s791_s7, %s1225_s6 }
 0x20d   : > { %p793_p9 = pnand %p792_p8, %p1301_p13 }
 0x20e   : > { %p798_p11 = por %p797_p2, %p796_p1 }
 0x20f   : > { %p794_p10 = pneg %p793_p9 }
 0x210   : > { %p800_p7 = por %p799_p12, %p798_p11 }
 0x212   : > { %p801_p3 = pnand %p800_p7, %p794_p10 }
 0x214   : > { %804 = shalt.err (!%p801_p3)
}
 0x215   : > { %s857_s20 = smov 128   ;;  %s858_s26 = smov 8   ;;  %vm281_vm12 = vcmask 0  }
 0x216   : > { %676 = dma.vmem_to_hbm [thread:$0]  (%p1301_p13), %s1227_s22, 256, %s1225_s6, %s492_s9, %s857_s20, %s857_s20, %s858_s26  }
 0x217   : > { %p239_p6 = scmp.lt.s32.totalorder %s905_s19, 1 }
 0x219   : > { %s1309_s19 = smov (!%p239_p6, %s905_s19), 1 }
 0x21a   : > { %s244_s12 = scalar_lea.vmem %s1283_s4, %s1309_s19  ;;  %s241_s22 = scalar_lea.vmem %s1282_s3, %s1309_s19 }
 0x239   : > { %s667_s23 = spop %666 }
 0x23a   : > { %v280_v36 = vstv %s667_s23 }
 0x23b   : > { %282 = vst.msk [vmem:[%s244_s12] sm:$0x1] %vm281_vm12, %v280_v36 }
 0x25f   : > { %v479_v37 = vpop.xlane.xlu1 %478 }
 0x260   : > { %v480_v20 = vrot.slane %v479_v37, 4 }
 0x262   : > { %v481_v38 = vmax.f32 %v479_v37, %v480_v20 }
 0x264   : > { %v482_v39 = vrot.slane %v481_v38, 2 }
 0x266   : > { %v483_v40 = vmax.f32 %v481_v38, %v482_v39 }
 0x268   : > { %v484_v41 = vrot.slane %v483_v40, 1 }
 0x26a   : > { %v485_v42 = vmax.f32 %v483_v40, %v484_v41 }
 0x26c   : > { %668 = vpush %v485_v42 }
 0x29d   : > { %s669_s6 = spop %668 }
 0x29e   : > { %v487_v43 = vstv %s669_s6 }
 0x29f   : > { %488 = vst.msk [vmem:[%s241_s22] sm:$0x1] %vm281_vm12, %v487_v43 }
 0x2a0 PF: > { %s532_s9 = sand.u32 1, %s835_s15   ;;  %p1302_p13 = scmp.ne.s32.totalorder %s1290_s28, 0 }
 0x2a1   : > { %p1303_p4 = scmp.ge.s32.totalorder %s847_s18, 2  ;;  %s533_s30 = scalar_lea.sflag [#allocation4], %s532_s9 }
 0x2a3   : > { %p687_p5 = pnand %p1303_p4, %p1302_p13 }
 0x2a5   : > { %830 = dma.done.wait (!%p687_p5), %s533_s30, 256  }
 0x2a6   : > { %832 = vsyncadd (!%p687_p5), %s533_s30, 4294967040  ;;  %p19_p0 = scmp.ge.s32.totalorder %s909_s21, 4   ;;  %s1304_s15 = smov %s839_s16 }
 0x2a7   : > { %s1305_s16 = smov %s843_s17  ;;  %s1306_s17 = smov %s921_s24 }
 0x2a8   : > { %s1307_s18 = smov %s909_s21  ;;  %21 = sbr.rel (!%p19_p0) target bundleno = 6 (0x6), region = 102 }
 0x2af   :  { %550 = vsyncpa [#allocation3], 1 }
 0x2b0   :  { %552 = vsyncpa [#allocation3 + $0x1], 1 }
 0x2b1   :  { %553 = vsyncpa [#allocation4], 1 }
 0x2b2   :  { %555 = vsyncpa [#allocation4 + $0x1], 1 }
 0x2b3   :  { %556 = vsyncpa [#allocation5], 1 }
 0x2b4   :  { %558 = vsyncpa [#allocation5 + $0x1], 1 }

</bundles_post_ra>
